<compile_context>
chip_gen: v7x
topology: tpu7x:2x2x1
jax: 0.10.0
libtpu: 0.0.40
codegen_flags: <defaults>
</compile_context>

<pallas_src>
import functools

import jax
import jax.numpy as jnp
from jax import lax
from jax.experimental import pallas as pl
from jax.experimental.pallas import tpu as pltpu


def _round_up(x, m):
    return (x + m - 1) // m * m


def _nbytes(shape, dtype):
    n = 1
    for s in shape:
        n *= int(s)
    return n * jnp.dtype(dtype).itemsize


def _tensorcores_per_chip():
    """Best-effort TensorCore count per chip (v7x=2, v5e/v6e=1); safe fallback = 1."""
    try:
        info = pltpu.get_tpu_info()
        for name in ("num_tensorcores", "tensorcore_count", "num_cores",
                     "core_count", "num_tensor_cores"):
            v = getattr(info, name, None)
            if isinstance(v, int) and v >= 1:
                return v
    except Exception:
        pass
    try:
        if "v7" in jax.devices()[0].device_kind.lower():
            return 2
    except Exception:
        pass
    return 1


def _vmem_capacity_bytes():
    try:
        v = int(pltpu.get_tpu_info().vmem_capacity_bytes)
        if v > 0:
            return v
    except Exception:
        pass
    return 64 << 20  # conservative: valid on v5e / v6e / v7x


def encoder_kernel(x_ref, wih_ref, whh_ref, brnn_ref,
                   w1_ref, b1_ref, w2_ref, b2_ref,
                   out_ref, hid_ref, *, t_chunk, t_unroll):
    # x_ref:   (T, Bb, E)  pre-gathered embeddings (dropout=identity), time-major
    # out_ref: (T, Bb, H)  RNN outputs, time-major (lane-dense per-step stores)
    # hid_ref: (Bb, D)     tanh(Linear2(ReLU(Linear1(h_T))))
    T, Bb, E = x_ref.shape
    H = whh_ref.shape[1]

    # --- Chunked hoisted input projection: out[t] = x[t] @ W_ih + (b_ih + b_hh).
    # Small per-chunk matmuls keep live values bounded (no (T*Bb, H) temporary) while
    # staying MXU-well-shaped; results land directly in out_ref, which doubles as
    # scratch for the recurrence below.
    def proj_chunk(c, carry):
        t0 = pl.multiple_of(c * t_chunk, t_chunk)
        xc = x_ref[pl.ds(t0, t_chunk)].reshape(t_chunk * Bb, E)
        yc = jnp.dot(xc, wih_ref[...],
                     preferred_element_type=jnp.float32) + brnn_ref[...]
        out_ref[pl.ds(t0, t_chunk)] = yc.reshape(t_chunk, Bb, H).astype(out_ref.dtype)
        return carry

    lax.fori_loop(0, T // t_chunk, proj_chunk, 0)

    w_hh = whh_ref[...]  # (H, H) f32, hoisted; recurrence stays f32 for numerics

    def step(t, h_prev):
        # single (Bb, H) @ (H, H) MXU call per step on the serial critical path
        h_new = jnp.tanh(out_ref[t]
                         + jnp.dot(h_prev, w_hh,
                                   preferred_element_type=jnp.float32))
        out_ref[t] = h_new.astype(out_ref.dtype)       # dense (Bb, H) slab store
        return h_new

    h_last = lax.fori_loop(0, T, step, jnp.zeros((Bb, H), jnp.float32),
                           unroll=t_unroll)

    # hidden = tanh(Linear2(ReLU(Linear1(h_last))))  (accumulate in f32)
    cdt = w1_ref.dtype
    z = jnp.maximum(jnp.dot(h_last.astype(cdt), w1_ref[...],
                            preferred_element_type=jnp.float32) + b1_ref[...], 0.0)
    hid = jnp.tanh(jnp.dot(z.astype(cdt), w2_ref[...],
                           preferred_element_type=jnp.float32) + b2_ref[...])
    hid_ref[...] = hid.astype(hid_ref.dtype)


def prepare_params(params, compute_dtype=None):
    """Pad parameters ONCE to TPU-friendly shapes (outside the per-call path).

    compute_dtype controls the operands of the non-recurrent matmuls (x@W_ih and the
    MLP head). None -> auto: bf16 only when the contraction dims are production-size
    (>=256 lanes); at small/demo sizes stay f32 for exact parity with PyTorch.
    The W_hh recurrence matmul always stays f32.
    """
    V, E = params["emb"].shape
    H = params["w_hh"].shape[0]
    D = params["w2"].shape[1]
    Ep, Hp, Dp = (_round_up(d, 128) for d in (E, H, D))
    if compute_dtype is None:
        compute_dtype = jnp.bfloat16 if max(Ep, Hp) >= 256 else jnp.float32
    cdt = jnp.dtype(compute_dtype)

    prep = {
        "emb":   jnp.pad(params["emb"], ((0, 0), (0, Ep - E))),
        "w_ih":  jnp.pad(params["w_ih"], ((0, Ep - E), (0, Hp - H))).astype(cdt),
        "w_hh":  jnp.pad(params["w_hh"], ((0, Hp - H), (0, Hp - H))),          # f32
        "b_rnn": jnp.pad(params["b_rnn"], ((0, 0), (0, Hp - H))),              # b_ih+b_hh
        "w1":    jnp.pad(params["w1"], ((0, Hp - H), (0, Hp - H))).astype(cdt),
        "b1":    jnp.pad(params["b1"], ((0, 0), (0, Hp - H))),
        "w2":    jnp.pad(params["w2"], ((0, Hp - H), (0, Dp - D))).astype(cdt),
        "b2":    jnp.pad(params["b2"], ((0, 0), (0, Dp - D))),
    }
    dims = dict(V=V, E=E, H=H, D=D, Ep=Ep, Hp=Hp, Dp=Dp, cdt=cdt)
    return prep, dims


def encoder_forward(tokens, prep, dims):
    B, T = tokens.shape
    Ep, Hp, Dp = dims["Ep"], dims["Hp"], dims["Dp"]
    H, D = dims["H"], dims["D"]
    cdt = dims["cdt"]
    Bp = _round_up(B, 8)

    # Embedding gather (dropout == identity in eval) directly in time-major layout from
    # the pre-padded table: single HBM pass, no separate swapaxes pass.
    x = jnp.take(prep["emb"], tokens.T, axis=0)                 # (T, B, Ep)
    x = jnp.pad(x, ((0, 0), (0, Bp - B), (0, 0))).astype(cdt)

    # Core-count-aware batch blocking: only split B across grid steps when the chip has
    # >1 TensorCore (v7x); on single-TC v5e/v6e the split would just starve the MXU.
    ncores = _tensorcores_per_chip()
    if ncores >= 2 and Bp % (8 * ncores) == 0 and Bp // ncores >= 8:
        b_blk = Bp // ncores
    else:
        b_blk = Bp
    nb = Bp // b_blk

    # Time-chunk size for the hoisted projection; bounded unroll for the recurrence.
    t_chunk = next(c for c in (8, 4, 2, 1) if T % c == 0)
    t_unroll = T if T <= 16 else 8

    # Explicit scoped-VMEM budget sized to the actual blocks (x2: double buffering),
    # clamped to physical VMEM so it is valid on every generation.
    need = 2 * (_nbytes((T, b_blk, Ep), cdt)
                + _nbytes((T, b_blk, Hp), jnp.float32)
                + _nbytes((b_blk, Dp), jnp.float32)
                + _nbytes((Ep, Hp), cdt)
                + _nbytes((Hp, Hp), jnp.float32)
                + _nbytes((Hp, Hp), cdt)
                + _nbytes((Hp, Dp), cdt)
                + 3 * _nbytes((1, max(Hp, Dp)), jnp.float32))
    vmem_limit = int(min(max(need + (4 << 20), 16 << 20), _vmem_capacity_bytes()))

    kernel = functools.partial(encoder_kernel, t_chunk=t_chunk, t_unroll=t_unroll)

    out_p, hid_p = pl.pallas_call(
        kernel,
        out_shape=(jax.ShapeDtypeStruct((T, Bp, Hp), jnp.float32),
                   jax.ShapeDtypeStruct((Bp, Dp), jnp.float32)),
        grid=(nb,),
        in_specs=[
            pl.BlockSpec((T, b_blk, Ep), lambda i: (0, i, 0)),   # x (time-major)
            pl.BlockSpec((Ep, Hp), lambda i: (0, 0)),            # W_ih
            pl.BlockSpec((Hp, Hp), lambda i: (0, 0)),            # W_hh (f32)
            pl.BlockSpec((1, Hp), lambda i: (0, 0)),             # b_ih + b_hh
            pl.BlockSpec((Hp, Hp), lambda i: (0, 0)),            # W1
            pl.BlockSpec((1, Hp), lambda i: (0, 0)),             # b1
            pl.BlockSpec((Hp, Dp), lambda i: (0, 0)),            # W2
            pl.BlockSpec((1, Dp), lambda i: (0, 0)),             # b2
        ],
        out_specs=(pl.BlockSpec((T, b_blk, Hp), lambda i: (0, i, 0)),
                   pl.BlockSpec((b_blk, Dp), lambda i: (i, 0))),
        compiler_params=pltpu.CompilerParams(
            dimension_semantics=("parallel",),
            vmem_limit_bytes=vmem_limit),
    )(x, prep["w_ih"], prep["w_hh"], prep["b_rnn"],
      prep["w1"], prep["b1"], prep["w2"], prep["b2"])

    out = jnp.swapaxes(out_p[:, :B, :H], 0, 1)                  # (B, T, H) batch-first
    hidden = hid_p[:B, :D][None, :, :]                          # (1, B, D) like nn.RNN
    return out, hidden


def make_params(key, input_size, emb_size, enc_hidden, dec_hidden):
    ks = jax.random.split(key, 8)
    s = 0.1
    return {
        "emb":   s * jax.random.normal(ks[0], (input_size, emb_size), jnp.float32),
        "w_ih":  s * jax.random.normal(ks[1], (emb_size, enc_hidden), jnp.float32),
        "w_hh":  s * jax.random.normal(ks[2], (enc_hidden, enc_hidden), jnp.float32),
        "b_rnn": s * jax.random.normal(ks[3], (1, enc_hidden), jnp.float32),
        "w1":    s * jax.random.normal(ks[4], (enc_hidden, enc_hidden), jnp.float32),
        "b1":    s * jax.random.normal(ks[5], (1, enc_hidden), jnp.float32),
        "w2":    s * jax.random.normal(ks[6], (enc_hidden, dec_hidden), jnp.float32),
        "b2":    s * jax.random.normal(ks[7], (1, dec_hidden), jnp.float32),
    }


def reference_forward(tokens, p):
    """Pure-JAX reference replicating the PyTorch forward (eval mode)."""
    x = jnp.take(p["emb"], tokens, axis=0)                      # (B, T, E)
    B, T, _ = x.shape
    H = p["w_hh"].shape[0]

    def step(h, x_t):
        h_new = jnp.tanh(x_t @ p["w_ih"] + h @ p["w_hh"] + p["b_rnn"])
        return h_new, h_new

    h0 = jnp.zeros((B, H), jnp.float32)
    h_last, outs = lax.scan(step, h0, jnp.swapaxes(x, 0, 1))
    output = jnp.swapaxes(outs, 0, 1)                           # (B, T, H)
    z = jnp.maximum(h_last @ p["w1"] + p["b1"], 0.0)
    hidden = jnp.tanh(z @ p["w2"] + p["b2"])[None]              # (1, B, D)
    return output, hidden


if __name__ == "__main__":
    # small shapes consistent with the module
    INPUT_SIZE = 64     # vocab
    EMB_SIZE = 32
    ENC_HIDDEN = 32
    DEC_HIDDEN = 32
    B, T = 2, 8

    key = jax.random.PRNGKey(0)
    k_tok, k_par = jax.random.split(key)
    tokens = jax.random.randint(k_tok, (B, T), 0, INPUT_SIZE, dtype=jnp.int32)
    params = make_params(k_par, INPUT_SIZE, EMB_SIZE, ENC_HIDDEN, DEC_HIDDEN)
    ref_out, ref_hidden = reference_forward(tokens, params)

    # 1) Default (auto) precision -> f32 at these small dims: exact parity.
    prep, dims = prepare_params(params)
    out, hidden = encoder_forward(tokens, prep, dims)
    out = jax.block_until_ready(out)
    hidden = jax.block_until_ready(hidden)
    assert out.shape == (B, T, ENC_HIDDEN)
    assert hidden.shape == (1, B, DEC_HIDDEN)
    assert jnp.allclose(out, ref_out, atol=1e-5, rtol=1e-5)
    assert jnp.allclose(hidden, ref_hidden, atol=1e-5, rtol=1e-5)

    # 2) bf16 non-recurrent matmuls (the production-size MXU fast path), looser tolerance.
    prep16, dims16 = prepare_params(params, compute_dtype=jnp.bfloat16)
    out16, hid16 = encoder_forward(tokens, prep16, dims16)
    out16 = jax.block_until_ready(out16)
    hid16 = jax.block_until_ready(hid16)
    assert jnp.allclose(out16, ref_out, atol=3e-2, rtol=3e-2)
    assert jnp.allclose(hid16, ref_hidden, atol=3e-2, rtol=3e-2)

    print("KERNEL_OK")
</pallas_src>

<mosaic_0001>
module attributes {stable_mosaic.version = 11 : i64} {
  func.func @encoder_kernel(%arg0: i32, %arg1: memref<8x8x128xf32, #tpu.memory_space<vmem>>, %arg2: memref<128x128xf32, #tpu.memory_space<vmem>>, %arg3: memref<128x128xf32, #tpu.memory_space<vmem>>, %arg4: memref<1x128xf32, #tpu.memory_space<vmem>>, %arg5: memref<128x128xf32, #tpu.memory_space<vmem>>, %arg6: memref<1x128xf32, #tpu.memory_space<vmem>>, %arg7: memref<128x128xf32, #tpu.memory_space<vmem>>, %arg8: memref<1x128xf32, #tpu.memory_space<vmem>>, %arg9: memref<8x8x128xf32, #tpu.memory_space<vmem>>, %arg10: memref<8x128xf32, #tpu.memory_space<vmem>>) attributes {dimension_semantics = [#tpu.dimension_semantics<parallel>], iteration_bounds = array<i64: 1>, scalar_prefetch = 0 : i64, scratch_operands = 0 : i64, tpu.core_type = #tpu.core_type<tc>, window_params = [{transform_indices = @transform_0, window_bounds = array<i64: 8, 8, 128>}, {pipeline_mode = #tpu.pipeline_mode<synchronous>, transform_indices = @transform_1, window_bounds = array<i64: 128, 128>}, {pipeline_mode = #tpu.pipeline_mode<synchronous>, transform_indices = @transform_2, window_bounds = array<i64: 128, 128>}, {pipeline_mode = #tpu.pipeline_mode<synchronous>, transform_indices = @transform_3, window_bounds = array<i64: 1, 128>}, {pipeline_mode = #tpu.pipeline_mode<synchronous>, transform_indices = @transform_4, window_bounds = array<i64: 128, 128>}, {pipeline_mode = #tpu.pipeline_mode<synchronous>, transform_indices = @transform_5, window_bounds = array<i64: 1, 128>}, {pipeline_mode = #tpu.pipeline_mode<synchronous>, transform_indices = @transform_6, window_bounds = array<i64: 128, 128>}, {pipeline_mode = #tpu.pipeline_mode<synchronous>, transform_indices = @transform_7, window_bounds = array<i64: 1, 128>}, {transform_indices = @transform_8, window_bounds = array<i64: 8, 8, 128>}, {transform_indices = @transform_9, window_bounds = array<i64: 8, 128>}]} {
    %c0_i32 = arith.constant 0 : i32
    %c8_i32 = arith.constant 8 : i32
    %0 = arith.muli %c0_i32, %c8_i32 : i32
    %1 = tpu.assume_multiple %0, 8 : i32
    %2 = arith.index_cast %1 : i32 to index
    %c0 = arith.constant 0 : index
    %c0_0 = arith.constant 0 : index
    %3 = vector.load %arg1[%2, %c0, %c0_0] : memref<8x8x128xf32, #tpu.memory_space<vmem>>, vector<8x8x128xf32>
    %4 = vector.shape_cast %3 : vector<8x8x128xf32> to vector<64x128xf32>
    %c0_1 = arith.constant 0 : index
    %c0_2 = arith.constant 0 : index
    %5 = vector.load %arg2[%c0_1, %c0_2] : memref<128x128xf32, #tpu.memory_space<vmem>>, vector<128x128xf32>
    %cst = arith.constant dense<0.000000e+00> : vector<64x128xf32>
    %6 = tpu.matmul %4, %5, %cst {dimension_numbers = #tpu.dot_dimension_numbers<[1], [0], [0], [1], [0, 0, 1, 1], [], []>} : vector<64x128xf32>, vector<128x128xf32>, vector<64x128xf32> -> vector<64x128xf32>
    %c0_3 = arith.constant 0 : index
    %c0_4 = arith.constant 0 : index
    %7 = vector.load %arg4[%c0_3, %c0_4] : memref<1x128xf32, #tpu.memory_space<vmem>>, vector<1x128xf32>
    %8 = vector.broadcast %7 : vector<1x128xf32> to vector<64x128xf32>
    %9 = arith.addf %6, %8 : vector<64x128xf32>
    %10 = vector.shape_cast %9 : vector<64x128xf32> to vector<8x8x128xf32>
    %11 = arith.index_cast %1 : i32 to index
    %c0_5 = arith.constant 0 : index
    %c0_6 = arith.constant 0 : index
    %12 = vector.load %arg9[%11, %c0_5, %c0_6] : memref<8x8x128xf32, #tpu.memory_space<vmem>>, vector<8x8x128xf32>
    tpu.vector_store %arg9[%11, %c0_5, %c0_6], %10 {strides = array<i32>} : memref<8x8x128xf32, #tpu.memory_space<vmem>>, vector<8x8x128xf32>,
    %c1_i32 = arith.constant 1 : i32
    %c0_7 = arith.constant 0 : index
    %c0_8 = arith.constant 0 : index
    %13 = vector.load %arg3[%c0_7, %c0_8] : memref<128x128xf32, #tpu.memory_space<vmem>>, vector<128x128xf32>
    %cst_9 = arith.constant 0.000000e+00 : f32
    %14 = vector.broadcast %cst_9 : f32 to vector<8x128xf32>
    %c0_i32_10 = arith.constant 0 : i32
    %15 = arith.index_cast %c0_i32_10 : i32 to index
    %c0_11 = arith.constant 0 : index
    %c0_12 = arith.constant 0 : index
    %16 = vector.load %arg9[%15, %c0_11, %c0_12] : memref<8x8x128xf32, #tpu.memory_space<vmem>>, vector<1x8x128xf32>
    %17 = vector.shape_cast %16 : vector<1x8x128xf32> to vector<8x128xf32>
    %cst_13 = arith.constant dense<0.000000e+00> : vector<8x128xf32>
    %18 = tpu.matmul %14, %13, %cst_13 {dimension_numbers = #tpu.dot_dimension_numbers<[1], [0], [0], [1], [0, 0, 1, 1], [], []>} : vector<8x128xf32>, vector<128x128xf32>, vector<8x128xf32> -> vector<8x128xf32>
    %19 = arith.addf %17, %18 : vector<8x128xf32>
    %20 = math.tanh %19 : vector<8x128xf32>
    %21 = arith.index_cast %c0_i32_10 : i32 to index
    %c0_14 = arith.constant 0 : index
    %c0_15 = arith.constant 0 : index
    %22 = vector.load %arg9[%21, %c0_14, %c0_15] : memref<8x8x128xf32, #tpu.memory_space<vmem>>, vector<1x8x128xf32>
    %23 = vector.shape_cast %22 : vector<1x8x128xf32> to vector<8x128xf32>
    %24 = vector.shape_cast %20 : vector<8x128xf32> to vector<1x8x128xf32>
    tpu.vector_store %arg9[%21, %c0_14, %c0_15], %24 {strides = array<i32>} : memref<8x8x128xf32, #tpu.memory_space<vmem>>, vector<1x8x128xf32>,
    %c1_i32_16 = arith.constant 1 : i32
    %25 = arith.index_cast %c1_i32_16 : i32 to index
    %c0_17 = arith.constant 0 : index
    %c0_18 = arith.constant 0 : index
    %26 = vector.load %arg9[%25, %c0_17, %c0_18] : memref<8x8x128xf32, #tpu.memory_space<vmem>>, vector<1x8x128xf32>
    %27 = vector.shape_cast %26 : vector<1x8x128xf32> to vector<8x128xf32>
    %cst_19 = arith.constant dense<0.000000e+00> : vector<8x128xf32>
    %28 = tpu.matmul %20, %13, %cst_19 {dimension_numbers = #tpu.dot_dimension_numbers<[1], [0], [0], [1], [0, 0, 1, 1], [], []>} : vector<8x128xf32>, vector<128x128xf32>, vector<8x128xf32> -> vector<8x128xf32>
    %29 = arith.addf %27, %28 : vector<8x128xf32>
    %30 = math.tanh %29 : vector<8x128xf32>
    %31 = arith.index_cast %c1_i32_16 : i32 to index
    %c0_20 = arith.constant 0 : index
    %c0_21 = arith.constant 0 : index
    %32 = vector.load %arg9[%31, %c0_20, %c0_21] : memref<8x8x128xf32, #tpu.memory_space<vmem>>, vector<1x8x128xf32>
    %33 = vector.shape_cast %32 : vector<1x8x128xf32> to vector<8x128xf32>
    %34 = vector.shape_cast %30 : vector<8x128xf32> to vector<1x8x128xf32>
    tpu.vector_store %arg9[%31, %c0_20, %c0_21], %34 {strides = array<i32>} : memref<8x8x128xf32, #tpu.memory_space<vmem>>, vector<1x8x128xf32>,
    %c2_i32 = arith.constant 2 : i32
    %35 = arith.index_cast %c2_i32 : i32 to index
    %c0_22 = arith.constant 0 : index
    %c0_23 = arith.constant 0 : index
    %36 = vector.load %arg9[%35, %c0_22, %c0_23] : memref<8x8x128xf32, #tpu.memory_space<vmem>>, vector<1x8x128xf32>
    %37 = vector.shape_cast %36 : vector<1x8x128xf32> to vector<8x128xf32>
    %cst_24 = arith.constant dense<0.000000e+00> : vector<8x128xf32>
    %38 = tpu.matmul %30, %13, %cst_24 {dimension_numbers = #tpu.dot_dimension_numbers<[1], [0], [0], [1], [0, 0, 1, 1], [], []>} : vector<8x128xf32>, vector<128x128xf32>, vector<8x128xf32> -> vector<8x128xf32>
    %39 = arith.addf %37, %38 : vector<8x128xf32>
    %40 = math.tanh %39 : vector<8x128xf32>
    %41 = arith.index_cast %c2_i32 : i32 to index
    %c0_25 = arith.constant 0 : index
    %c0_26 = arith.constant 0 : index
    %42 = vector.load %arg9[%41, %c0_25, %c0_26] : memref<8x8x128xf32, #tpu.memory_space<vmem>>, vector<1x8x128xf32>
    %43 = vector.shape_cast %42 : vector<1x8x128xf32> to vector<8x128xf32>
    %44 = vector.shape_cast %40 : vector<8x128xf32> to vector<1x8x128xf32>
    tpu.vector_store %arg9[%41, %c0_25, %c0_26], %44 {strides = array<i32>} : memref<8x8x128xf32, #tpu.memory_space<vmem>>, vector<1x8x128xf32>,
    %c3_i32 = arith.constant 3 : i32
    %45 = arith.index_cast %c3_i32 : i32 to index
    %c0_27 = arith.constant 0 : index
    %c0_28 = arith.constant 0 : index
    %46 = vector.load %arg9[%45, %c0_27, %c0_28] : memref<8x8x128xf32, #tpu.memory_space<vmem>>, vector<1x8x128xf32>
    %47 = vector.shape_cast %46 : vector<1x8x128xf32> to vector<8x128xf32>
    %cst_29 = arith.constant dense<0.000000e+00> : vector<8x128xf32>
    %48 = tpu.matmul %40, %13, %cst_29 {dimension_numbers = #tpu.dot_dimension_numbers<[1], [0], [0], [1], [0, 0, 1, 1], [], []>} : vector<8x128xf32>, vector<128x128xf32>, vector<8x128xf32> -> vector<8x128xf32>
    %49 = arith.addf %47, %48 : vector<8x128xf32>
    %50 = math.tanh %49 : vector<8x128xf32>
    %51 = arith.index_cast %c3_i32 : i32 to index
    %c0_30 = arith.constant 0 : index
    %c0_31 = arith.constant 0 : index
    %52 = vector.load %arg9[%51, %c0_30, %c0_31] : memref<8x8x128xf32, #tpu.memory_space<vmem>>, vector<1x8x128xf32>
    %53 = vector.shape_cast %52 : vector<1x8x128xf32> to vector<8x128xf32>
    %54 = vector.shape_cast %50 : vector<8x128xf32> to vector<1x8x128xf32>
    tpu.vector_store %arg9[%51, %c0_30, %c0_31], %54 {strides = array<i32>} : memref<8x8x128xf32, #tpu.memory_space<vmem>>, vector<1x8x128xf32>,
    %c4_i32 = arith.constant 4 : i32
    %55 = arith.index_cast %c4_i32 : i32 to index
    %c0_32 = arith.constant 0 : index
    %c0_33 = arith.constant 0 : index
    %56 = vector.load %arg9[%55, %c0_32, %c0_33] : memref<8x8x128xf32, #tpu.memory_space<vmem>>, vector<1x8x128xf32>
    %57 = vector.shape_cast %56 : vector<1x8x128xf32> to vector<8x128xf32>
    %cst_34 = arith.constant dense<0.000000e+00> : vector<8x128xf32>
    %58 = tpu.matmul %50, %13, %cst_34 {dimension_numbers = #tpu.dot_dimension_numbers<[1], [0], [0], [1], [0, 0, 1, 1], [], []>} : vector<8x128xf32>, vector<128x128xf32>, vector<8x128xf32> -> vector<8x128xf32>
    %59 = arith.addf %57, %58 : vector<8x128xf32>
    %60 = math.tanh %59 : vector<8x128xf32>
    %61 = arith.index_cast %c4_i32 : i32 to index
    %c0_35 = arith.constant 0 : index
    %c0_36 = arith.constant 0 : index
    %62 = vector.load %arg9[%61, %c0_35, %c0_36] : memref<8x8x128xf32, #tpu.memory_space<vmem>>, vector<1x8x128xf32>
    %63 = vector.shape_cast %62 : vector<1x8x128xf32> to vector<8x128xf32>
    %64 = vector.shape_cast %60 : vector<8x128xf32> to vector<1x8x128xf32>
    tpu.vector_store %arg9[%61, %c0_35, %c0_36], %64 {strides = array<i32>} : memref<8x8x128xf32, #tpu.memory_space<vmem>>, vector<1x8x128xf32>,
    %c5_i32 = arith.constant 5 : i32
    %65 = arith.index_cast %c5_i32 : i32 to index
    %c0_37 = arith.constant 0 : index
    %c0_38 = arith.constant 0 : index
    %66 = vector.load %arg9[%65, %c0_37, %c0_38] : memref<8x8x128xf32, #tpu.memory_space<vmem>>, vector<1x8x128xf32>
    %67 = vector.shape_cast %66 : vector<1x8x128xf32> to vector<8x128xf32>
    %cst_39 = arith.constant dense<0.000000e+00> : vector<8x128xf32>
    %68 = tpu.matmul %60, %13, %cst_39 {dimension_numbers = #tpu.dot_dimension_numbers<[1], [0], [0], [1], [0, 0, 1, 1], [], []>} : vector<8x128xf32>, vector<128x128xf32>, vector<8x128xf32> -> vector<8x128xf32>
    %69 = arith.addf %67, %68 : vector<8x128xf32>
    %70 = math.tanh %69 : vector<8x128xf32>
    %71 = arith.index_cast %c5_i32 : i32 to index
    %c0_40 = arith.constant 0 : index
    %c0_41 = arith.constant 0 : index
    %72 = vector.load %arg9[%71, %c0_40, %c0_41] : memref<8x8x128xf32, #tpu.memory_space<vmem>>, vector<1x8x128xf32>
    %73 = vector.shape_cast %72 : vector<1x8x128xf32> to vector<8x128xf32>
    %74 = vector.shape_cast %70 : vector<8x128xf32> to vector<1x8x128xf32>
    tpu.vector_store %arg9[%71, %c0_40, %c0_41], %74 {strides = array<i32>} : memref<8x8x128xf32, #tpu.memory_space<vmem>>, vector<1x8x128xf32>,
    %c6_i32 = arith.constant 6 : i32
    %75 = arith.index_cast %c6_i32 : i32 to index
    %c0_42 = arith.constant 0 : index
    %c0_43 = arith.constant 0 : index
    %76 = vector.load %arg9[%75, %c0_42, %c0_43] : memref<8x8x128xf32, #tpu.memory_space<vmem>>, vector<1x8x128xf32>
    %77 = vector.shape_cast %76 : vector<1x8x128xf32> to vector<8x128xf32>
    %cst_44 = arith.constant dense<0.000000e+00> : vector<8x128xf32>
    %78 = tpu.matmul %70, %13, %cst_44 {dimension_numbers = #tpu.dot_dimension_numbers<[1], [0], [0], [1], [0, 0, 1, 1], [], []>} : vector<8x128xf32>, vector<128x128xf32>, vector<8x128xf32> -> vector<8x128xf32>
    %79 = arith.addf %77, %78 : vector<8x128xf32>
    %80 = math.tanh %79 : vector<8x128xf32>
    %81 = arith.index_cast %c6_i32 : i32 to index
    %c0_45 = arith.constant 0 : index
    %c0_46 = arith.constant 0 : index
    %82 = vector.load %arg9[%81, %c0_45, %c0_46] : memref<8x8x128xf32, #tpu.memory_space<vmem>>, vector<1x8x128xf32>
    %83 = vector.shape_cast %82 : vector<1x8x128xf32> to vector<8x128xf32>
    %84 = vector.shape_cast %80 : vector<8x128xf32> to vector<1x8x128xf32>
    tpu.vector_store %arg9[%81, %c0_45, %c0_46], %84 {strides = array<i32>} : memref<8x8x128xf32, #tpu.memory_space<vmem>>, vector<1x8x128xf32>,
    %c7_i32 = arith.constant 7 : i32
    %85 = arith.index_cast %c7_i32 : i32 to index
    %c0_47 = arith.constant 0 : index
    %c0_48 = arith.constant 0 : index
    %86 = vector.load %arg9[%85, %c0_47, %c0_48] : memref<8x8x128xf32, #tpu.memory_space<vmem>>, vector<1x8x128xf32>
    %87 = vector.shape_cast %86 : vector<1x8x128xf32> to vector<8x128xf32>
    %cst_49 = arith.constant dense<0.000000e+00> : vector<8x128xf32>
    %88 = tpu.matmul %80, %13, %cst_49 {dimension_numbers = #tpu.dot_dimension_numbers<[1], [0], [0], [1], [0, 0, 1, 1], [], []>} : vector<8x128xf32>, vector<128x128xf32>, vector<8x128xf32> -> vector<8x128xf32>
    %89 = arith.addf %87, %88 : vector<8x128xf32>
    %90 = math.tanh %89 : vector<8x128xf32>
    %91 = arith.index_cast %c7_i32 : i32 to index
    %c0_50 = arith.constant 0 : index
    %c0_51 = arith.constant 0 : index
    %92 = vector.load %arg9[%91, %c0_50, %c0_51] : memref<8x8x128xf32, #tpu.memory_space<vmem>>, vector<1x8x128xf32>
    %93 = vector.shape_cast %92 : vector<1x8x128xf32> to vector<8x128xf32>
    %94 = vector.shape_cast %90 : vector<8x128xf32> to vector<1x8x128xf32>
    tpu.vector_store %arg9[%91, %c0_50, %c0_51], %94 {strides = array<i32>} : memref<8x8x128xf32, #tpu.memory_space<vmem>>, vector<1x8x128xf32>,
    %c8_i32_52 = arith.constant 8 : i32
    %c0_53 = arith.constant 0 : index
    %c0_54 = arith.constant 0 : index
    %95 = vector.load %arg5[%c0_53, %c0_54] : memref<128x128xf32, #tpu.memory_space<vmem>>, vector<128x128xf32>
    %cst_55 = arith.constant dense<0.000000e+00> : vector<8x128xf32>
    %96 = tpu.matmul %90, %95, %cst_55 {dimension_numbers = #tpu.dot_dimension_numbers<[1], [0], [0], [1], [0, 0, 1, 1], [], []>} : vector<8x128xf32>, vector<128x128xf32>, vector<8x128xf32> -> vector<8x128xf32>
    %c0_56 = arith.constant 0 : index
    %c0_57 = arith.constant 0 : index
    %97 = vector.load %arg6[%c0_56, %c0_57] : memref<1x128xf32, #tpu.memory_space<vmem>>, vector<1x128xf32>
    %98 = vector.broadcast %97 : vector<1x128xf32> to vector<8x128xf32>
    %99 = arith.addf %96, %98 : vector<8x128xf32>
    %cst_58 = arith.constant 0.000000e+00 : f32
    %100 = vector.broadcast %cst_58 : f32 to vector<8x128xf32>
    %101 = arith.maximumf %99, %100 : vector<8x128xf32>
    %c0_59 = arith.constant 0 : index
    %c0_60 = arith.constant 0 : index
    %102 = vector.load %arg7[%c0_59, %c0_60] : memref<128x128xf32, #tpu.memory_space<vmem>>, vector<128x128xf32>
    %cst_61 = arith.constant dense<0.000000e+00> : vector<8x128xf32>
    %103 = tpu.matmul %101, %102, %cst_61 {dimension_numbers = #tpu.dot_dimension_numbers<[1], [0], [0], [1], [0, 0, 1, 1], [], []>} : vector<8x128xf32>, vector<128x128xf32>, vector<8x128xf32> -> vector<8x128xf32>
    %c0_62 = arith.constant 0 : index
    %c0_63 = arith.constant 0 : index
    %104 = vector.load %arg8[%c0_62, %c0_63] : memref<1x128xf32, #tpu.memory_space<vmem>>, vector<1x128xf32>
    %105 = vector.broadcast %104 : vector<1x128xf32> to vector<8x128xf32>
    %106 = arith.addf %103, %105 : vector<8x128xf32>
    %107 = math.tanh %106 : vector<8x128xf32>
    %c0_64 = arith.constant 0 : index
    %c0_65 = arith.constant 0 : index
    %108 = vector.load %arg10[%c0_64, %c0_65] : memref<8x128xf32, #tpu.memory_space<vmem>>, vector<8x128xf32>
    tpu.vector_store %arg10[%c0_64, %c0_65], %107 {strides = array<i32>} : memref<8x128xf32, #tpu.memory_space<vmem>>, vector<8x128xf32>,
    return
  }
  func.func @transform_0(%arg0: i32) -> (i32, i32, i32) {
    %c0_i32 = arith.constant 0 : i32
    %c0_i32_0 = arith.constant 0 : i32
    %c0_i32_1 = arith.constant 0 : i32
    return %c0_i32, %arg0, %c0_i32_0 : i32, i32, i32
  }
  func.func @transform_1(%arg0: i32) -> (i32, i32) {
    %c0_i32 = arith.constant 0 : i32
    %c0_i32_0 = arith.constant 0 : i32
    %c0_i32_1 = arith.constant 0 : i32
    return %c0_i32, %c0_i32_0 : i32, i32
  }
  func.func @transform_2(%arg0: i32) -> (i32, i32) {
    %c0_i32 = arith.constant 0 : i32
    %c0_i32_0 = arith.constant 0 : i32
    %c0_i32_1 = arith.constant 0 : i32
    return %c0_i32, %c0_i32_0 : i32, i32
  }
  func.func @transform_3(%arg0: i32) -> (i32, i32) {
    %c0_i32 = arith.constant 0 : i32
    %c0_i32_0 = arith.constant 0 : i32
    %c0_i32_1 = arith.constant 0 : i32
    return %c0_i32, %c0_i32_0 : i32, i32
  }
  func.func @transform_4(%arg0: i32) -> (i32, i32) {
    %c0_i32 = arith.constant 0 : i32
    %c0_i32_0 = arith.constant 0 : i32
    %c0_i32_1 = arith.constant 0 : i32
    return %c0_i32, %c0_i32_0 : i32, i32
  }
  func.func @transform_5(%arg0: i32) -> (i32, i32) {
    %c0_i32 = arith.constant 0 : i32
    %c0_i32_0 = arith.constant 0 : i32
    %c0_i32_1 = arith.constant 0 : i32
    return %c0_i32, %c0_i32_0 : i32, i32
  }
  func.func @transform_6(%arg0: i32) -> (i32, i32) {
    %c0_i32 = arith.constant 0 : i32
    %c0_i32_0 = arith.constant 0 : i32
    %c0_i32_1 = arith.constant 0 : i32
    return %c0_i32, %c0_i32_0 : i32, i32
  }
  func.func @transform_7(%arg0: i32) -> (i32, i32) {
    %c0_i32 = arith.constant 0 : i32
    %c0_i32_0 = arith.constant 0 : i32
    %c0_i32_1 = arith.constant 0 : i32
    return %c0_i32, %c0_i32_0 : i32, i32
  }
  func.func @transform_8(%arg0: i32) -> (i32, i32, i32) {
    %c0_i32 = arith.constant 0 : i32
    %c0_i32_0 = arith.constant 0 : i32
    %c0_i32_1 = arith.constant 0 : i32
    return %c0_i32, %arg0, %c0_i32_0 : i32, i32, i32
  }
  func.func @transform_9(%arg0: i32) -> (i32, i32) {
    %c0_i32 = arith.constant 0 : i32
    %c0_i32_0 = arith.constant 0 : i32
    return %arg0, %c0_i32 : i32, i32
  }
}

</mosaic_0001>

<bundles_post_ra>
// kernel: tpu_custom_call.1
= control target key start
LH: loop header
LB: loop body
LE: loop exit
PB: predicated region body
PF: predicated region fallthrough
CT: control target
= control target key end

     0   :  { %15 = vsyncpa [#allocation3], 0  ;;  %s2532_s0 = inlined_call_operand.hbm [shape: f32[8,8,128], index: 0, kind: input, shape index: {}]   ;;  %s2533_s1 = inlined_call_operand.hbm [shape: f32[128,128], index: 1, kind: input, shape index: {}]   ;;  %s2534_s2 = inlined_call_operand.hbm [shape: f32[128,128], index: 2, kind: input, shape index: {}]   ;;  %s2535_s3 = inlined_call_operand.vmem [shape: f32[1,128], index: 3, kind: input, shape index: {}]   ;;  %s2536_s4 = inlined_call_operand.hbm [shape: f32[128,128], index: 4, kind: input, shape index: {}]   ;;  %s2537_s5 = inlined_call_operand.vmem [shape: f32[1,128], index: 5, kind: input, shape index: {}]   ;;  %s2538_s6 = inlined_call_operand.hbm [shape: f32[128,128], index: 6, kind: input, shape index: {}]   ;;  %s2539_s7 = inlined_call_operand.vmem [shape: f32[1,128], index: 7, kind: input, shape index: {}]   ;;  %s2540_s8 = inlined_call_operand.hbm [shape: f32[8,8,128], index: 8, kind: output, shape index: {0}]   ;;  %s2541_s9 = inlined_call_operand.hbm [shape: f32[8,128], index: 9, kind: output, shape index: {1}]  }
   0x1   :  { %16 = vsyncpa [#allocation6], 0 }
   0x2   :  { %17 = vsyncpa [#allocation9], 0 }
   0x3   :  { %18 = vsyncpa [#allocation4], 0 }
   0x4   :  { %19 = vsyncpa [#allocation13], 0  ;;  %s2142_s30 = smov [#allocation5]   ;;  %s2143_s11 = smov [#allocation8]  }
   0x5   :  { %s37_s10 = sshll.u32 %s2142_s30, 4  ;;  %s63_s12 = sshll.u32 %s2143_s11, 4  ;;  %s38_s10 = int_to_ptr.vmem [resolvable:$true] %s37_s10  ;;  %s2204_s12 = int_to_ptr.vmem [resolvable:$true] %s63_s12 }
   0x6   :  { %s1978_s15 = scalar_lea.hbm %s2533_s1, 2048 }
   0x7   :  { %p1979_p0 = scmp.ne.s32.totalorder %s2533_s1, %s1978_s15  ;;  %p1982_p1 = scmp.lt.u32.totalorder %s1978_s15, %s2533_s1 }
   0x9   :  { %p1984_p2 = pnand %p1982_p1, %p1979_p0 }
   0xb   :  { %1987 = shalt.err (!%p1984_p2)
}
   0xc   :  { %s1988_s20 = scalar_lea.vmem %s38_s10, 2048  ;;  %p1993_p4 = scmp.lt.s32.totalorder %s38_s10, %s38_s10 }
   0xd   :  { %p1989_p3 = scmp.ne.s32.totalorder %s38_s10, %s1988_s20  ;;  %p1994_p5 = scmp.lt.s32.totalorder %s1988_s20, %s1988_s20 }
   0xf   :  { %p1995_p6 = por %p1994_p5, %p1993_p4 }
  0x11   :  { %p1996_p7 = pnand %p1995_p6, %p1989_p3 }
  0x13   :  { %1999 = shalt.err (!%p1996_p7)
}
  0x14   :  { %s2144_s21 = smov 128   ;;  %s2145_s22 = smov 8  }
  0x15   :  { %43 = dma.hbm_to_vmem [thread:$0]  %s2533_s1, 2048, %s38_s10, [#allocation6], %s2144_s21, %s2144_s21, %s2145_s22  }
  0x16   :  { %s2000_s27 = scalar_lea.hbm %s2536_s4, 2048 }
  0x17   :  { %p2001_p8 = scmp.ne.s32.totalorder %s2536_s4, %s2000_s27  ;;  %p2004_p9 = scmp.lt.u32.totalorder %s2000_s27, %s2536_s4 }
  0x19   :  { %p2006_p10 = pnand %p2004_p9, %p2001_p8 }
  0x1b   :  { %2009 = shalt.err (!%p2006_p10)
}
  0x1c   :  { %s2010_s13 = scalar_lea.vmem %s2204_s12, 2048  ;;  %p2015_p12 = scmp.lt.s32.totalorder %s2204_s12, %s2204_s12 }
  0x1d   :  { %p2011_p11 = scmp.ne.s32.totalorder %s2204_s12, %s2010_s13  ;;  %p2016_p13 = scmp.lt.s32.totalorder %s2010_s13, %s2010_s13 }
  0x1f   :  { %p2017_p0 = por %p2016_p13, %p2015_p12 }
  0x21   :  { %p2018_p1 = pnand %p2017_p0, %p2011_p11 }
  0x23   :  { %2021 = shalt.err (!%p2018_p1)
}
  0x24   :  { %69 = dma.hbm_to_vmem [thread:$0]  %s2536_s4, 2048, %s2204_s12, [#allocation9], %s2144_s21, %s2144_s21, %s2145_s22  }
  0x25   :  { %s2146_s14 = smov [#allocation2]   ;;  %s2147_s16 = smov [#allocation7]  }
  0x26   :  { %s25_s15 = sshll.u32 %s2146_s14, 4  ;;  %s49_s17 = sshll.u32 %s2147_s16, 4  ;;  %s26_s15 = int_to_ptr.vmem [resolvable:$true] %s25_s15  ;;  %s2241_s17 = int_to_ptr.vmem [resolvable:$true] %s49_s17 }
  0x27   :  { %s2022_s20 = scalar_lea.hbm %s2532_s0, 1024 }
  0x28   :  { %p2023_p2 = scmp.ne.s32.totalorder %s2532_s0, %s2022_s20  ;;  %p2026_p3 = scmp.lt.u32.totalorder %s2022_s20, %s2532_s0 }
  0x2a   :  { %p2028_p4 = pnand %p2026_p3, %p2023_p2 }
  0x2c   :  { %2031 = shalt.err (!%p2028_p4)
}
  0x2d   :  { %s2032_s4 = scalar_lea.vmem %s26_s15, 1024  ;;  %p2037_p6 = scmp.lt.s32.totalorder %s26_s15, %s26_s15 }
  0x2e   :  { %p2033_p5 = scmp.ne.s32.totalorder %s26_s15, %s2032_s4  ;;  %p2038_p7 = scmp.lt.s32.totalorder %s2032_s4, %s2032_s4 }
  0x30   :  { %p2039_p8 = por %p2038_p7, %p2037_p6 }
  0x32   :  { %p2040_p9 = pnand %p2039_p8, %p2033_p5 }
  0x34   :  { %2043 = shalt.err (!%p2040_p9)
}
  0x35   :  { %31 = dma.hbm_to_vmem [thread:$0]  %s2532_s0, 1024, %s26_s15, [#allocation3], %s2144_s21, %s2144_s21, %s2145_s22  }
  0x36   :  { %s2044_s30 = scalar_lea.hbm %s2534_s2, 2048 }
  0x37   :  { %p2045_p10 = scmp.ne.s32.totalorder %s2534_s2, %s2044_s30  ;;  %p2048_p11 = scmp.lt.u32.totalorder %s2044_s30, %s2534_s2 }
  0x39   :  { %p2050_p12 = pnand %p2048_p11, %p2045_p10 }
  0x3b   :  { %2053 = shalt.err (!%p2050_p12)
}
  0x3c   :  { %s2054_s14 = scalar_lea.vmem %s2241_s17, 2048  ;;  %p2059_p0 = scmp.lt.s32.totalorder %s2241_s17, %s2241_s17 }
  0x3d   :  { %p2055_p13 = scmp.ne.s32.totalorder %s2241_s17, %s2054_s14  ;;  %p2060_p1 = scmp.lt.s32.totalorder %s2054_s14, %s2054_s14 }
  0x3f   :  { %p2061_p2 = por %p2060_p1, %p2059_p0 }
  0x41   :  { %p2062_p3 = pnand %p2061_p2, %p2055_p13 }
  0x43   :  { %2065 = shalt.err (!%p2062_p3)
}
  0x44   :  { %55 = dma.hbm_to_vmem [thread:$0]  %s2534_s2, 2048, %s2241_s17, [#allocation6], %s2144_s21, %s2144_s21, %s2145_s22  }
  0x45   :  { %s2148_s16 = smov [#allocation10]   ;;  %s2066_s23 = scalar_lea.hbm %s2538_s6, 2048 }
  0x46   :  { %s77_s18 = sshll.u32 %s2148_s16, 4  ;;  %p2067_p4 = scmp.ne.s32.totalorder %s2538_s6, %s2066_s23  ;;  %s78_s18 = int_to_ptr.vmem [resolvable:$true] %s77_s18 }
  0x47   :  { %p2070_p5 = scmp.lt.u32.totalorder %s2066_s23, %s2538_s6 }
  0x49   :  { %p2072_p6 = pnand %p2070_p5, %p2067_p4 }
  0x4b   :  { %2075 = shalt.err (!%p2072_p6)
}
  0x4c   :  { %s2076_s12 = scalar_lea.vmem %s78_s18, 2048  ;;  %p2081_p8 = scmp.lt.s32.totalorder %s78_s18, %s78_s18 }
  0x4d   :  { %p2077_p7 = scmp.ne.s32.totalorder %s78_s18, %s2076_s12  ;;  %p2082_p9 = scmp.lt.s32.totalorder %s2076_s12, %s2076_s12 }
  0x4f   :  { %p2083_p10 = por %p2082_p9, %p2081_p8 }
  0x51   :  { %p2084_p11 = pnand %p2083_p10, %p2077_p7 }
  0x53   :  { %2087 = shalt.err (!%p2084_p11)
}
  0x54   :  { %83 = dma.hbm_to_vmem [thread:$0]  %s2538_s6, 2048, %s78_s18, [#allocation9], %s2144_s21, %s2144_s21, %s2145_s22  }
  0x55   :  { %2132 = dma.done.wait [#allocation3], 1024  }
  0x56   :  { %2133 = vsyncadd [#allocation3], 4294966272 }
  0x57   :  { %2134 = dma.done.wait [#allocation6], 4096  }
  0x58   :  { %2135 = vsyncadd [#allocation6], 4294963200 }
  0x59   :  { %2136 = dma.done.wait [#allocation9], 4096  }
  0x5a   :  { %2137 = vsyncadd [#allocation9], 4294963200  ;;  %v2149_v0 = vmov 0.0|0.0   ;;  %vm2150_vm0 = vmmov 0   ;;  %v2151_v1 = vmov 0.0   ;;  %v111_v2 = vld [vmem:[#allocation5] sm:$0xff] }
  0x5b   :  { %1708 = vmatprep.subr.bf16.mxu1 %v2149_v0  ;;  %1358 = vmatprep.mubr.msk.f32.mxu1 %vm2150_vm0, %v2151_v1  ;;  %v112_v3 = vld [vmem:[#allocation5 + $0x8] sm:$0xff]  ;;  %v113_v4 = vld [vmem:[#allocation5 + $0x10] sm:$0xff]  ;;  %v114_v6 = vld [vmem:[#allocation5 + $0x18] sm:$0xff]  ;;  %s2152_s29 = smov [#allocation11]  }
  0x5c   :  { %v1676_v5 = vpack.c.bf16 %v112_v3, %v111_v2  ;;  %v115_v7 = vld [vmem:[#allocation5 + $0x20] sm:$0xff]  ;;  %v1680_v8 = vpack.c.bf16 %v114_v6, %v113_v4  ;;  %v116_v9 = vld [vmem:[#allocation5 + $0x28] sm:$0xff]  ;;  %v250_v13 = vld [vmem:[#allocation7 + $0x10] sm:$0xff]  ;;  %s1057_s30 = sshll.u32 %s2152_s29, 4  ;;  %s1058_s30 = int_to_ptr.vmem [resolvable:$true] %s1057_s30 }
  0x5d   :  { %v248_v10 = vld [vmem:[#allocation7] sm:$0xff]  ;;  %v249_v11 = vld [vmem:[#allocation7 + $0x8] sm:$0xff]  ;;  %v251_v14 = vld [vmem:[#allocation7 + $0x18] sm:$0xff]  ;;  %v1684_v15 = vpack.c.bf16 %v116_v9, %v115_v7  ;;  %s2088_s11 = scalar_lea.vmem %s1058_s30, 1024  ;;  %p2093_p13 = scmp.lt.s32.totalorder %s1058_s30, %s1058_s30 }
  0x5e   :  { %1677 = vmatprep.subr.bf16.mxu0 %v1676_v5  ;;  %v2296_v12 = vpack.c.bf16 %v249_v11, %v248_v10  ;;  %v117_v16 = vld [vmem:[#allocation5 + $0x30] sm:$0xff]  ;;  %v2299_v17 = vpack.c.bf16 %v251_v14, %v250_v13  ;;  %v118_v18 = vld [vmem:[#allocation5 + $0x38] sm:$0xff]  ;;  %v252_v19 = vld [vmem:[#allocation7 + $0x20] sm:$0xff]  ;;  %p2089_p12 = scmp.ne.s32.totalorder %s1058_s30, %s2088_s11  ;;  %p2094_p0 = scmp.lt.s32.totalorder %s2088_s11, %s2088_s11 }
  0x5f   :  { %1679 = vmatpush3.bf16.msra.mxu0 %v1676_v5  ;;  %v253_v20 = vld [vmem:[#allocation7 + $0x28] sm:$0xff]  ;;  %v103_v21 = vld [vmem:[#allocation2] sm:$0xff]  ;;  %v1688_v22 = vpack.c.bf16 %v118_v18, %v117_v16  ;;  %v254_v26 = vld [vmem:[#allocation7 + $0x30] sm:$0xff] }
  0x60   :  { %1681 = vmatprep.subr.bf16.mxu0 %v1680_v8  ;;  %1710 = vmatpush3.bf16.msra.mxu1 %v2296_v12  ;;  %v119_v23 = vld [vmem:[#allocation5 + $0x40] sm:$0xff]  ;;  %v2303_v24 = vpack.c.bf16 %v253_v20, %v252_v19  ;;  %v120_v25 = vld [vmem:[#allocation5 + $0x48] sm:$0xff]  ;;  %v255_v27 = vld [vmem:[#allocation7 + $0x38] sm:$0xff]  ;;  %p2095_p1 = por %p2094_p0, %p2093_p13 }
  0x61   :  { %1711 = vmatprep.subr.bf16.mxu1 %v2149_v0  ;;  %1314 = vmatprep.mubr.f32.mxu0 %v103_v21  ;;  %v1692_v28 = vpack.c.bf16 %v120_v25, %v119_v23  ;;  %v121_v29 = vld [vmem:[#allocation5 + $0x50] sm:$0xff]  ;;  %v2307_v30 = vpack.c.bf16 %v255_v27, %v254_v26  ;;  %v122_v31 = vld [vmem:[#allocation5 + $0x58] sm:$0xff]  ;;  %v256_v32 = vld [vmem:[#allocation7 + $0x40] sm:$0xff] }
  0x62   :  { %v257_v33 = vld [vmem:[#allocation7 + $0x48] sm:$0xff]  ;;  %v1696_v34 = vpack.c.bf16 %v122_v31, %v121_v29  ;;  %v123_v35 = vld [vmem:[#allocation5 + $0x60] sm:$0xff]  ;;  %v258_v38 = vld [vmem:[#allocation7 + $0x50] sm:$0xff]  ;;  %p2096_p2 = pnand %p2095_p1, %p2089_p12 }
  0x63   :  { %1683 = vmatpush3.bf16.msra.mxu0 %v1680_v8  ;;  %v2311_v36 = vpack.c.bf16 %v257_v33, %v256_v32  ;;  %v124_v37 = vld [vmem:[#allocation5 + $0x68] sm:$0xff]  ;;  %v259_v39 = vld [vmem:[#allocation7 + $0x58] sm:$0xff]  ;;  %v125_v41 = vld [vmem:[#allocation5 + $0x70] sm:$0xff] }
  0x64   :  { %1685 = vmatprep.subr.bf16.mxu0 %v1684_v15  ;;  %1713 = vmatpush3.bf16.msra.mxu1 %v2299_v17  ;;  %v1700_v40 = vpack.c.bf16 %v124_v37, %v123_v35  ;;  %v2315_v42 = vpack.c.bf16 %v259_v39, %v258_v38  ;;  %v126_v43 = vld [vmem:[#allocation5 + $0x78] sm:$0xff]  ;;  %v260_v44 = vld [vmem:[#allocation7 + $0x60] sm:$0xff]  ;;  %v261_v45 = vld [vmem:[#allocation7 + $0x68] sm:$0xff] }
  0x65   :  { %1714 = vmatprep.subr.bf16.mxu1 %v2149_v0  ;;  %v1704_v46 = vpack.c.bf16 %v126_v43, %v125_v41  ;;  %v2319_v47 = vpack.c.bf16 %v261_v45, %v260_v44  ;;  %v262_v48 = vld [vmem:[#allocation7 + $0x70] sm:$0xff]  ;;  %v263_v49 = vld [vmem:[#allocation7 + $0x78] sm:$0xff]  ;;  %v104_v51 = vld [vmem:[#allocation2 + $0x8] sm:$0xff] }
  0x66   :  { %v2323_v50 = vpack.c.bf16 %v263_v49, %v262_v48  ;;  %v105_v52 = vld [vmem:[#allocation2 + $0x10] sm:$0xff]  ;;  %v106_v53 = vld [vmem:[#allocation2 + $0x18] sm:$0xff]  ;;  %v107_v54 = vld [vmem:[#allocation2 + $0x20] sm:$0xff] }
  0x67   :  { %1687 = vmatpush3.bf16.msra.mxu0 %v1684_v15  ;;  %v108_v55 = vld [vmem:[#allocation2 + $0x28] sm:$0xff]  ;;  %v109_v56 = vld [vmem:[#allocation2 + $0x30] sm:$0xff]  ;;  %v110_v57 = vld [vmem:[#allocation2 + $0x38] sm:$0xff] }
  0x68   :  { %1689 = vmatprep.subr.bf16.mxu0 %v1688_v22  ;;  %1716 = vmatpush3.bf16.msra.mxu1 %v2303_v24  ;;  %v2369_v58 = vld [vmem:[%s2535_s3] ss:$0 sm:$0xff]  ;;  %v865_v37 = vld [vmem:[#allocation8 + $0x10] sm:$0xff]  ;;  %v866_v39 = vld [vmem:[#allocation8 + $0x18] sm:$0xff] }
  0x69   :  { %1717 = vmatprep.subr.bf16.mxu1 %v2149_v0  ;;  %v863_v35 = vld [vmem:[#allocation8] sm:$0xff]  ;;  %v869_v44 = vld [vmem:[#allocation8 + $0x30] sm:$0xff]  ;;  %v870_v45 = vld [vmem:[#allocation8 + $0x38] sm:$0xff] }
  0x6a   :  { %v867_v41 = vld [vmem:[#allocation8 + $0x20] sm:$0xff]  ;;  %v872_v48 = vld [vmem:[#allocation8 + $0x48] sm:$0xff] }
  0x6b   :  { %1691 = vmatpush3.bf16.msra.mxu0 %v1688_v22 }
  0x6c   :  { %1693 = vmatprep.subr.bf16.mxu0 %v1692_v28  ;;  %1719 = vmatpush3.bf16.msra.mxu1 %v2307_v30 }
  0x6d   :  { %1720 = vmatprep.subr.bf16.mxu1 %v2149_v0 }
  0x6f   :  { %1695 = vmatpush3.bf16.msra.mxu0 %v1692_v28 }
  0x70   :  { %1697 = vmatprep.subr.bf16.mxu0 %v1696_v34  ;;  %1722 = vmatpush3.bf16.msra.mxu1 %v2311_v36 }
  0x71   :  { %1723 = vmatprep.subr.bf16.mxu1 %v2149_v0 }
  0x73   :  { %1699 = vmatpush3.bf16.msra.mxu0 %v1696_v34 }
  0x74   :  { %1701 = vmatprep.subr.bf16.mxu0 %v1700_v40  ;;  %1725 = vmatpush3.bf16.msra.mxu1 %v2315_v42 }
  0x75   :  { %1726 = vmatprep.subr.bf16.mxu1 %v2149_v0 }
  0x77   :  { %1703 = vmatpush3.bf16.msra.mxu0 %v1700_v40  ;;  %v1904_v40 = vpack.c.bf16 %v866_v39, %v865_v37 }
  0x78   :  { %1705 = vmatprep.subr.bf16.mxu0 %v1704_v46  ;;  %1728 = vmatpush3.bf16.msra.mxu1 %v2319_v47 }
  0x79   :  { %1729 = vmatprep.subr.bf16.mxu1 %v2149_v0 }
  0x7b   :  { %1707 = vmatpush3.bf16.msra.mxu0 %v1704_v46  ;;  %v1910_v46 = vpack.c.bf16 %v870_v45, %v869_v44 }
  0x7c   :  { %1731 = vmatpush3.bf16.msra.mxu1 %v2323_v50  ;;  %1732 = vmatprep.subr.bf16.mxu0 %v2149_v0 }
  0x7d   :  { %1756 = vmatprep.subr.bf16.mxu1 %v2149_v0 }
  0x7e   :  { %1315 = vmatmul.mubr.f32.vlgmr.msra.gmra.mrb[0].mxu0 %v104_v51 }
  0x7f   :  { %1359 = vmatmul.mubr.f32.vlgmr.msra.gmra.mrb[0].mxu1 %v2151_v1  ;;  %1734 = vmatpush3.bf16.msra.mxu0 %v2296_v12 }
  0x80   :  { %1735 = vmatprep.subr.bf16.mxu0 %v2149_v0  ;;  %1758 = vmatpush3.bf16.msra.mxu1 %v2296_v12 }
  0x81   :  { %1759 = vmatprep.subr.bf16.mxu1 %v2149_v0  ;;  %1428 = vmatprep.mubr.msk.f32.mxu1 %vm2150_vm0, %v2151_v1 }
  0x82   :  { %1317 = vmatprep.mubr.f32.mxu0 %v105_v52 }
  0x83   :  { %1737 = vmatpush3.bf16.msra.mxu0 %v2299_v17 }
  0x84   :  { %1738 = vmatprep.subr.bf16.mxu0 %v2149_v0  ;;  %1761 = vmatpush3.bf16.msra.mxu1 %v2299_v17 }
  0x85   :  { %1762 = vmatprep.subr.bf16.mxu1 %v2149_v0  ;;  %1318 = vmatmul.mubr.f32.gmra.mrb[2].mxu0 %v106_v53 }
  0x86   :  { %1320 = vmatprep.mubr.f32.mxu0 %v107_v54 }
  0x87   :  { %1740 = vmatpush3.bf16.msra.mxu0 %v2303_v24 }
  0x88   :  { %1741 = vmatprep.subr.bf16.mxu0 %v2149_v0  ;;  %1764 = vmatpush3.bf16.msra.mxu1 %v2303_v24 }
  0x89   :  { %1765 = vmatprep.subr.bf16.mxu1 %v2149_v0  ;;  %1321 = vmatmul.mubr.f32.gmra.mrb[4].mxu0 %v108_v55  ;;  %v873_v55 = vld [vmem:[#allocation8 + $0x50] sm:$0xff] }
  0x8a   :  { %1323 = vmatprep.mubr.f32.mxu0 %v109_v56  ;;  %v874_v56 = vld [vmem:[#allocation8 + $0x58] sm:$0xff] }
  0x8b   :  { %1743 = vmatpush3.bf16.msra.mxu0 %v2307_v30 }
  0x8c   :  { %1744 = vmatprep.subr.bf16.mxu0 %v2149_v0  ;;  %1767 = vmatpush3.bf16.msra.mxu1 %v2307_v30 }
  0x8d   :  { %1768 = vmatprep.subr.bf16.mxu1 %v2149_v0  ;;  %1324 = vmatmul.mubr.f32.gmra.mrb[6].mxu0 %v110_v57  ;;  %v1916_v57 = vpack.c.bf16 %v874_v56, %v873_v55 }
  0x8e   :  { %1393 = vmatprep.mubr.msk.f32.mxu0 %vm2150_vm0, %v2151_v1 }
  0x8f   :  { %1746 = vmatpush3.bf16.msra.mxu0 %v2311_v36 }
  0x90   :  { %1747 = vmatprep.subr.bf16.mxu0 %v2149_v0  ;;  %1770 = vmatpush3.bf16.msra.mxu1 %v2311_v36 }
  0x91   :  { %1771 = vmatprep.subr.bf16.mxu1 %v2149_v0 }
  0x93   :  { %1749 = vmatpush3.bf16.msra.mxu0 %v2315_v42 }
  0x94   :  { %1750 = vmatprep.subr.bf16.mxu0 %v2149_v0  ;;  %1773 = vmatpush3.bf16.msra.mxu1 %v2315_v42 }
  0x95   :  { %1774 = vmatprep.subr.bf16.mxu1 %v2149_v0 }
  0x97   :  { %1752 = vmatpush3.bf16.msra.mxu0 %v2319_v47 }
  0x98   :  { %1753 = vmatprep.subr.bf16.mxu0 %v2149_v0  ;;  %1776 = vmatpush3.bf16.msra.mxu1 %v2319_v47 }
  0x99   :  { %1777 = vmatprep.subr.bf16.mxu1 %v2149_v0 }
  0x9b   :  { %1755 = vmatpush3.bf16.msra.mxu0 %v2323_v50 }
  0x9c   :  { %1779 = vmatpush3.bf16.msra.mxu1 %v2323_v50  ;;  %1780 = vmatprep.subr.bf16.mxu0 %v2149_v0 }
  0x9d   :  { %1804 = vmatprep.subr.bf16.mxu1 %v2149_v0 }
 0x151   :  { %v1316_v59 = vpop.f32.mrb[0].mxu0 }
 0x152   :  { %v200_v60 = vpop.f32.mrb[1].mxu0  ;;  %v331_v61 = vpop.f32.mrb[0].mxu1  ;;  %v206_v10 = vadd.f32 %v1316_v59, %v2369_v58  ;;  %v875_v59 = vld [vmem:[#allocation8 + $0x60] sm:$0xff] }
 0x153   :  { %v201_v62 = vadd.f32 %v2369_v58, %v200_v60  ;;  %v1360_v63 = vpop.f32.mrb[1].mxu1  ;;  %v876_v60 = vld [vmem:[#allocation8 + $0x68] sm:$0xff] }
 0x154   :  { %v878_v63 = vld [vmem:[#allocation8 + $0x78] sm:$0xff] }
 0x155   :  { %v335_v2 = vadd.f32 %v331_v61, %v201_v62  ;;  %v1919_v61 = vpack.c.bf16 %v876_v60, %v875_v59  ;;  %v877_v62 = vld [vmem:[#allocation8 + $0x70] sm:$0xff] }
 0x157   :  { %1960 = vtanh.f32 %v335_v2  ;;  %v1922_v2 = vpack.c.bf16 %v878_v63, %v877_v62 }
 0x158   :  { %v1319_v4 = vpop.f32.mrb[2].mxu0 }
 0x159   :  { %v210_v5 = vpop.f32.mrb[3].mxu0  ;;  %v216_v22 = vadd.f32 %v1319_v4, %v2369_v58  ;;  %v958_v4 = vld [vmem:[#allocation10 + $0x8] sm:$0xff] }
 0x15a   :  { %v211_v16 = vadd.f32 %v2369_v58, %v210_v5  ;;  %v959_v5 = vld [vmem:[#allocation10 + $0x10] sm:$0xff] }
 0x15c   :  { %v2390_v6 = vpop.f32.mrb[4].mxu0 }
 0x15d   :  { %v2392_v7 = vpop.f32.mrb[5].mxu0 }
 0x15e   :  { %v221_v28 = vadd.f32 %v2369_v58, %v2392_v7 }
 0x160   :  { %v2394_v8 = vpop.f32.mrb[6].mxu0 }
 0x161   :  { %v1961_v3 = vpop.eup %1960  ;;  %v2396_v9 = vpop.f32.mrb[7].mxu0 }
 0x162   :  { %337 = vst [vmem:[#allocation11] sm:$0xff] %v1961_v3  ;;  %1394 = vmatmul.mubr.f32.vlgmr.msra.gmra.mrb[8].mxu0 %v1961_v3  ;;  %v957_v3 = vld [vmem:[#allocation10] sm:$0xff] }
 0x163   :  { %1782 = vmatpush3.bf16.msra.mxu0 %v2296_v12  ;;  %1463 = vmatprep.mubr.msk.f32.mxu0 %vm2150_vm0, %v2151_v1 }
 0x164   :  { %1783 = vmatprep.subr.bf16.mxu0 %v2149_v0 }
 0x167   :  { %1785 = vmatpush3.bf16.msra.mxu0 %v2299_v17 }
 0x168   :  { %1786 = vmatprep.subr.bf16.mxu0 %v2149_v0 }
 0x16b   :  { %1788 = vmatpush3.bf16.msra.mxu0 %v2303_v24 }
 0x16c   :  { %1789 = vmatprep.subr.bf16.mxu0 %v2149_v0 }
 0x16f   :  { %1791 = vmatpush3.bf16.msra.mxu0 %v2307_v30 }
 0x170   :  { %1792 = vmatprep.subr.bf16.mxu0 %v2149_v0 }
 0x173   :  { %1794 = vmatpush3.bf16.msra.mxu0 %v2311_v36 }
 0x174   :  { %1795 = vmatprep.subr.bf16.mxu0 %v2149_v0 }
 0x177   :  { %1797 = vmatpush3.bf16.msra.mxu0 %v2315_v42 }
 0x178   :  { %1798 = vmatprep.subr.bf16.mxu0 %v2149_v0 }
 0x17b   :  { %1800 = vmatpush3.bf16.msra.mxu0 %v2319_v47 }
 0x17c   :  { %1801 = vmatprep.subr.bf16.mxu0 %v2149_v0 }
 0x17f   :  { %1803 = vmatpush3.bf16.msra.mxu0 %v2323_v50 }
 0x180   :  { %1828 = vmatprep.subr.bf16.mxu0 %v2149_v0 }
 0x235   :  { %v406_v11 = vpop.f32.mrb[8].mxu0 }
 0x236   :  { %v410_v13 = vadd.f32 %v406_v11, %v206_v10  ;;  %v1395_v14 = vpop.f32.mrb[9].mxu0  ;;  %v962_v10 = vld [vmem:[#allocation10 + $0x28] sm:$0xff] }
 0x237   :  { %v964_v14 = vld [vmem:[#allocation10 + $0x38] sm:$0xff] }
 0x238   :  { %1962 = vtanh.f32 %v410_v13  ;;  %v963_v13 = vld [vmem:[#allocation10 + $0x30] sm:$0xff] }
 0x242   :  { %v1963_v15 = vpop.eup %1962 }
 0x243   :  { %412 = vst [vmem:[#allocation11 + $0x8] sm:$0xff] %v1963_v15  ;;  %1429 = vmatmul.mubr.f32.vlgmr.msra.gmra.mrb[2].mxu1 %v1963_v15  ;;  %v1934_v15 = vpack.c.bf16 %v964_v14, %v963_v13 }
 0x244   :  { %1806 = vmatpush3.bf16.msra.mxu1 %v2296_v12  ;;  %1498 = vmatprep.mubr.msk.f32.mxu1 %vm2150_vm0, %v2151_v1 }
 0x245   :  { %1807 = vmatprep.subr.bf16.mxu1 %v2149_v0 }
 0x248   :  { %1809 = vmatpush3.bf16.msra.mxu1 %v2299_v17 }
 0x249   :  { %1810 = vmatprep.subr.bf16.mxu1 %v2149_v0 }
 0x24c   :  { %1812 = vmatpush3.bf16.msra.mxu1 %v2303_v24 }
 0x24d   :  { %1813 = vmatprep.subr.bf16.mxu1 %v2149_v0 }
 0x250   :  { %1815 = vmatpush3.bf16.msra.mxu1 %v2307_v30 }
 0x251   :  { %1816 = vmatprep.subr.bf16.mxu1 %v2149_v0 }
 0x254   :  { %1818 = vmatpush3.bf16.msra.mxu1 %v2311_v36 }
 0x255   :  { %1819 = vmatprep.subr.bf16.mxu1 %v2149_v0 }
 0x258   :  { %1821 = vmatpush3.bf16.msra.mxu1 %v2315_v42 }
 0x259   :  { %1822 = vmatprep.subr.bf16.mxu1 %v2149_v0 }
 0x25c   :  { %1824 = vmatpush3.bf16.msra.mxu1 %v2319_v47 }
 0x25d   :  { %1825 = vmatprep.subr.bf16.mxu1 %v2149_v0 }
 0x260   :  { %1827 = vmatpush3.bf16.msra.mxu1 %v2323_v50 }
 0x261   :  { %1852 = vmatprep.subr.bf16.mxu1 %v2149_v0 }
 0x316   :  { %v481_v18 = vpop.f32.mrb[2].mxu1 }
 0x317   :  { %v485_v19 = vadd.f32 %v481_v18, %v211_v16  ;;  %v1430_v20 = vpop.f32.mrb[3].mxu1  ;;  %v965_v16 = vld [vmem:[#allocation10 + $0x40] sm:$0xff]  ;;  %v966_v18 = vld [vmem:[#allocation10 + $0x48] sm:$0xff] }
 0x318   :  { %v967_v20 = vld [vmem:[#allocation10 + $0x50] sm:$0xff] }
 0x319   :  { %1964 = vtanh.f32 %v485_v19  ;;  %v1937_v19 = vpack.c.bf16 %v966_v18, %v965_v16 }
 0x323   :  { %v1965_v21 = vpop.eup %1964 }
 0x324   :  { %487 = vst [vmem:[#allocation11 + $0x10] sm:$0xff] %v1965_v21  ;;  %1464 = vmatmul.mubr.f32.vlgmr.msra.gmra.mrb[10].mxu0 %v1965_v21  ;;  %v968_v21 = vld [vmem:[#allocation10 + $0x58] sm:$0xff] }
 0x325   :  { %1830 = vmatpush3.bf16.msra.mxu0 %v2296_v12  ;;  %1533 = vmatprep.mubr.msk.f32.mxu0 %vm2150_vm0, %v2151_v1 }
 0x326   :  { %1831 = vmatprep.subr.bf16.mxu0 %v2149_v0 }
 0x329   :  { %1833 = vmatpush3.bf16.msra.mxu0 %v2299_v17 }
 0x32a   :  { %1834 = vmatprep.subr.bf16.mxu0 %v2149_v0 }
 0x32d   :  { %1836 = vmatpush3.bf16.msra.mxu0 %v2303_v24 }
 0x32e   :  { %1837 = vmatprep.subr.bf16.mxu0 %v2149_v0 }
 0x331   :  { %1839 = vmatpush3.bf16.msra.mxu0 %v2307_v30 }
 0x332   :  { %1840 = vmatprep.subr.bf16.mxu0 %v2149_v0 }
 0x335   :  { %1842 = vmatpush3.bf16.msra.mxu0 %v2311_v36 }
 0x336   :  { %1843 = vmatprep.subr.bf16.mxu0 %v2149_v0 }
 0x339   :  { %1845 = vmatpush3.bf16.msra.mxu0 %v2315_v42 }
 0x33a   :  { %1846 = vmatprep.subr.bf16.mxu0 %v2149_v0 }
 0x33d   :  { %1848 = vmatpush3.bf16.msra.mxu0 %v2319_v47 }
 0x33e   :  { %1849 = vmatprep.subr.bf16.mxu0 %v2149_v0 }
 0x341   :  { %1851 = vmatpush3.bf16.msra.mxu0 %v2323_v50 }
 0x342   :  { %1876 = vmatprep.subr.bf16.mxu0 %v2149_v0 }
 0x3f7   :  { %v556_v23 = vpop.f32.mrb[10].mxu0 }
 0x3f8   :  { %v560_v25 = vadd.f32 %v556_v23, %v216_v22  ;;  %v1465_v26 = vpop.f32.mrb[11].mxu0  ;;  %v1940_v22 = vpack.c.bf16 %v968_v21, %v967_v20  ;;  %v969_v23 = vld [vmem:[#allocation10 + $0x60] sm:$0xff] }
 0x3fa   :  { %1966 = vtanh.f32 %v560_v25  ;;  %v970_v25 = vld [vmem:[#allocation10 + $0x68] sm:$0xff] }
 0x3fb   :  { %v1943_v26 = vpack.c.bf16 %v970_v25, %v969_v23 }
 0x404   :  { %v1967_v27 = vpop.eup %1966 }
 0x405   :  { %562 = vst [vmem:[#allocation11 + $0x18] sm:$0xff] %v1967_v27  ;;  %1499 = vmatmul.mubr.f32.vlgmr.msra.gmra.mrb[4].mxu1 %v1967_v27  ;;  %v236_v27 = vadd.f32 %v2394_v8, %v2369_v58 }
 0x406   :  { %1854 = vmatpush3.bf16.msra.mxu1 %v2296_v12  ;;  %1568 = vmatprep.mubr.msk.f32.mxu1 %vm2150_vm0, %v2151_v1 }
 0x407   :  { %1855 = vmatprep.subr.bf16.mxu1 %v2149_v0 }
 0x40a   :  { %1857 = vmatpush3.bf16.msra.mxu1 %v2299_v17 }
 0x40b   :  { %1858 = vmatprep.subr.bf16.mxu1 %v2149_v0 }
 0x40e   :  { %1860 = vmatpush3.bf16.msra.mxu1 %v2303_v24 }
 0x40f   :  { %1861 = vmatprep.subr.bf16.mxu1 %v2149_v0 }
 0x412   :  { %1863 = vmatpush3.bf16.msra.mxu1 %v2307_v30 }
 0x413   :  { %1864 = vmatprep.subr.bf16.mxu1 %v2149_v0 }
 0x416   :  { %1866 = vmatpush3.bf16.msra.mxu1 %v2311_v36 }
 0x417   :  { %1867 = vmatprep.subr.bf16.mxu1 %v2149_v0 }
 0x41a   :  { %1869 = vmatpush3.bf16.msra.mxu1 %v2315_v42 }
 0x41b   :  { %1870 = vmatprep.subr.bf16.mxu1 %v2149_v0 }
 0x41e   :  { %1872 = vmatpush3.bf16.msra.mxu1 %v2319_v47 }
 0x41f   :  { %1873 = vmatprep.subr.bf16.mxu1 %v2149_v0 }
 0x422   :  { %1875 = vmatpush3.bf16.msra.mxu1 %v2323_v50 }
 0x423   :  { %1900 = vmatprep.subr.bf16.mxu1 %v2149_v0 }
 0x4d8   :  { %v631_v29 = vpop.f32.mrb[4].mxu1 }
 0x4d9   :  { %v635_v31 = vadd.f32 %v631_v29, %v221_v28  ;;  %v1500_v32 = vpop.f32.mrb[5].mxu1 }
 0x4db   :  { %1968 = vtanh.f32 %v635_v31 }
 0x4e5   :  { %v1969_v33 = vpop.eup %1968 }
 0x4e6   :  { %637 = vst [vmem:[#allocation11 + $0x20] sm:$0xff] %v1969_v33  ;;  %1534 = vmatmul.mubr.f32.vlgmr.msra.gmra.mrb[12].mxu0 %v1969_v33  ;;  %v971_v33 = vld [vmem:[#allocation10 + $0x70] sm:$0xff] }
 0x4e7   :  { %1878 = vmatpush3.bf16.msra.mxu0 %v2296_v12  ;;  %1603 = vmatprep.mubr.msk.f32.mxu0 %vm2150_vm0, %v2151_v1  ;;  %v226_v12 = vadd.f32 %v2390_v6, %v2369_v58  ;;  %v960_v6 = vld [vmem:[#allocation10 + $0x18] sm:$0xff] }
 0x4e8   :  { %1879 = vmatprep.subr.bf16.mxu0 %v2149_v0  ;;  %v1928_v7 = vpack.c.bf16 %v960_v6, %v959_v5 }
 0x4eb   :  { %1881 = vmatpush3.bf16.msra.mxu0 %v2299_v17 }
 0x4ec   :  { %1882 = vmatprep.subr.bf16.mxu0 %v2149_v0 }
 0x4ef   :  { %1884 = vmatpush3.bf16.msra.mxu0 %v2303_v24 }
 0x4f0   :  { %1885 = vmatprep.subr.bf16.mxu0 %v2149_v0 }
 0x4f3   :  { %1887 = vmatpush3.bf16.msra.mxu0 %v2307_v30 }
 0x4f4   :  { %1888 = vmatprep.subr.bf16.mxu0 %v2149_v0 }
 0x4f7   :  { %1890 = vmatpush3.bf16.msra.mxu0 %v2311_v36  ;;  %v864_v36 = vld [vmem:[#allocation8 + $0x8] sm:$0xff] }
 0x4f8   :  { %1891 = vmatprep.subr.bf16.mxu0 %v2149_v0  ;;  %v1901_v38 = vpack.c.bf16 %v864_v36, %v863_v35 }
 0x4fb   :  { %1893 = vmatpush3.bf16.msra.mxu0 %v2315_v42  ;;  %v868_v42 = vld [vmem:[#allocation8 + $0x28] sm:$0xff] }
 0x4fc   :  { %1894 = vmatprep.subr.bf16.mxu0 %v2149_v0  ;;  %v1907_v43 = vpack.c.bf16 %v868_v42, %v867_v41 }
 0x4ff   :  { %1896 = vmatpush3.bf16.msra.mxu0 %v2319_v47  ;;  %v871_v47 = vld [vmem:[#allocation8 + $0x40] sm:$0xff] }
 0x500   :  { %1897 = vmatprep.subr.bf16.mxu0 %v2149_v0  ;;  %v1913_v49 = vpack.c.bf16 %v872_v48, %v871_v47 }
 0x503   :  { %1899 = vmatpush3.bf16.msra.mxu0 %v2323_v50  ;;  %v231_v50 = vadd.f32 %v2369_v58, %v2396_v9  ;;  %v961_v9 = vld [vmem:[#allocation10 + $0x20] sm:$0xff] }
 0x504   :  { %1924 = vmatprep.subr.bf16.mxu0 %v2149_v0  ;;  %v1931_v11 = vpack.c.bf16 %v962_v10, %v961_v9 }
 0x5b9   :  { %v706_v17 = vpop.f32.mrb[12].mxu0 }
 0x5ba   :  { %v710_v24 = vadd.f32 %v706_v17, %v226_v12  ;;  %v1535_v30 = vpop.f32.mrb[13].mxu0  ;;  %v972_v12 = vld [vmem:[#allocation10 + $0x78] sm:$0xff] }
 0x5bb   :  { %v1946_v17 = vpack.c.bf16 %v972_v12, %v971_v33 }
 0x5bc   :  { %1970 = vtanh.f32 %v710_v24  ;;  %v1086_v24 = vld [vmem:[%s2537_s5] ss:$0 sm:$0xff] }
 0x5c6   :  { %v1971_v34 = vpop.eup %1970 }
 0x5c7   :  { %712 = vst [vmem:[#allocation11 + $0x28] sm:$0xff] %v1971_v34  ;;  %1569 = vmatmul.mubr.f32.vlgmr.msra.gmra.mrb[6].mxu1 %v1971_v34 }
 0x5c8   :  { %1638 = vmatprep.mubr.msk.f32.mxu1 %vm2150_vm0, %v2151_v1  ;;  %1902 = vmatpush3.bf16.msra.mxu1 %v1901_v38 }
 0x5c9   :  { %1903 = vmatprep.subr.bf16.mxu1 %v2149_v0 }
 0x5cc   :  { %1905 = vmatpush3.bf16.msra.mxu1 %v1904_v40 }
 0x5cd   :  { %1906 = vmatprep.subr.bf16.mxu1 %v2149_v0 }
 0x5d0   :  { %1908 = vmatpush3.bf16.msra.mxu1 %v1907_v43 }
 0x5d1   :  { %1909 = vmatprep.subr.bf16.mxu1 %v2149_v0 }
 0x5d4   :  { %1911 = vmatpush3.bf16.msra.mxu1 %v1910_v46 }
 0x5d5   :  { %1912 = vmatprep.subr.bf16.mxu1 %v2149_v0 }
 0x5d8   :  { %1914 = vmatpush3.bf16.msra.mxu1 %v1913_v49 }
 0x5d9   :  { %1915 = vmatprep.subr.bf16.mxu1 %v2149_v0 }
 0x5dc   :  { %1917 = vmatpush3.bf16.msra.mxu1 %v1916_v57 }
 0x5dd   :  { %1918 = vmatprep.subr.bf16.mxu1 %v2149_v0 }
 0x5e0   :  { %1920 = vmatpush3.bf16.msra.mxu1 %v1919_v61 }
 0x5e1   :  { %1921 = vmatprep.subr.bf16.mxu1 %v2149_v0 }
 0x5e4   :  { %1923 = vmatpush3.bf16.msra.mxu1 %v1922_v2 }
 0x69a   :  { %v781_v51 = vpop.f32.mrb[6].mxu1 }
 0x69b   :  { %v785_v52 = vadd.f32 %v781_v51, %v231_v50  ;;  %v1570_v53 = vpop.f32.mrb[7].mxu1 }
 0x69d   :  { %1972 = vtanh.f32 %v785_v52 }
 0x6a7   :  { %v1973_v54 = vpop.eup %1972 }
 0x6a8   :  { %787 = vst [vmem:[#allocation11 + $0x30] sm:$0xff] %v1973_v54  ;;  %1604 = vmatmul.mubr.f32.vlgmr.msra.gmra.mrb[14].mxu0 %v1973_v54 }
 0x6a9   :  { %1673 = vmatprep.mubr.msk.f32.mxu0 %vm2150_vm0, %v2151_v1  ;;  %v1925_v1 = vpack.c.bf16 %v958_v4, %v957_v3 }
 0x6ab   :  { %1926 = vmatpush3.bf16.msra.mxu0 %v1925_v1 }
 0x6ac   :  { %1927 = vmatprep.subr.bf16.mxu0 %v2149_v0 }
 0x6af   :  { %1929 = vmatpush3.bf16.msra.mxu0 %v1928_v7 }
 0x6b0   :  { %1930 = vmatprep.subr.bf16.mxu0 %v2149_v0 }
 0x6b3   :  { %1932 = vmatpush3.bf16.msra.mxu0 %v1931_v11 }
 0x6b4   :  { %1933 = vmatprep.subr.bf16.mxu0 %v2149_v0 }
 0x6b7   :  { %1935 = vmatpush3.bf16.msra.mxu0 %v1934_v15 }
 0x6b8   :  { %1936 = vmatprep.subr.bf16.mxu0 %v2149_v0 }
 0x6bb   :  { %1938 = vmatpush3.bf16.msra.mxu0 %v1937_v19 }
 0x6bc   :  { %1939 = vmatprep.subr.bf16.mxu0 %v2149_v0 }
 0x6bf   :  { %1941 = vmatpush3.bf16.msra.mxu0 %v1940_v22 }
 0x6c0   :  { %1942 = vmatprep.subr.bf16.mxu0 %v2149_v0 }
 0x6c3   :  { %1944 = vmatpush3.bf16.msra.mxu0 %v1943_v26 }
 0x6c4   :  { %1945 = vmatprep.subr.bf16.mxu0 %v2149_v0 }
 0x6c7   :  { %1947 = vmatpush3.bf16.msra.mxu0 %v1946_v17 }
 0x77b   :  { %v856_v28 = vpop.f32.mrb[14].mxu0 }
 0x77c   :  { %v860_v29 = vadd.f32 %v856_v28, %v236_v27  ;;  %v1605_v31 = vpop.f32.mrb[15].mxu0 }
 0x77e   :  { %1974 = vtanh.f32 %v860_v29 }
 0x788   :  { %v1975_v32 = vpop.eup %1974 }
 0x789   :  { %862 = vst [vmem:[#allocation11 + $0x38] sm:$0xff] %v1975_v32  ;;  %1639 = vmatmul.mubr.f32.vlgmr.msra.gmra.mrb[8].mxu1 %v1975_v32 }
 0x85c   :  { %v952_v30 = vpop.f32.mrb[8].mxu1 }
 0x85d   :  { %v953_v0 = vadd.f32 %v1086_v24, %v952_v30  ;;  %v1640_v34 = vpop.f32.mrb[9].mxu1 }
 0x85f   :  { %v956_v35 = vmax.f32 %v953_v0, 0.0 }
 0x861   :  { %1674 = vmatmul.mubr.f32.vlgmr.msra.gmra.mrb[16].mxu0 %v956_v35 }
 0x862   :  { %2099 = shalt.err (!%p2096_p2)
}
 0x863   :  { %s2100_s10 = scalar_lea.hbm %s2540_s8, 1024 }
 0x864   :  { %p2101_p3 = scmp.ne.s32.totalorder %s2540_s8, %s2100_s10  ;;  %p2104_p4 = scmp.lt.u32.totalorder %s2100_s10, %s2540_s8 }
 0x866   :  { %p2106_p5 = pnand %p2104_p4, %p2101_p3 }
 0x868   :  { %2109 = shalt.err (!%p2106_p5)
}
 0x869   :  { %1063 = dma.vmem_to_hbm [thread:$0]  %s1058_s30, 1024, %s2540_s8, [#allocation4], %s2144_s21, %s2144_s21, %s2145_s22  }
 0x86a   :  { %v1087_v58 = vld [vmem:[%s2539_s7] ss:$0 sm:$0xff]  ;;  %s2153_s23 = smov [#allocation12]  }
 0x86b   :  { %s1070_s24 = sshll.u32 %s2153_s23, 4  ;;  %s1071_s24 = int_to_ptr.vmem [resolvable:$true] %s1070_s24 }
 0x86c   :  { %s2110_s25 = scalar_lea.vmem %s1071_s24, 128  ;;  %p2115_p7 = scmp.lt.s32.totalorder %s1071_s24, %s1071_s24 }
 0x86d   :  { %p2111_p6 = scmp.ne.s32.totalorder %s1071_s24, %s2110_s25  ;;  %p2116_p8 = scmp.lt.s32.totalorder %s2110_s25, %s2110_s25 }
 0x86f   :  { %p2117_p9 = por %p2116_p8, %p2115_p7 }
 0x871   :  { %p2118_p10 = pnand %p2117_p9, %p2111_p6 }
 0x934   :  { %v1046_v8 = vpop.f32.mrb[16].mxu0 }
 0x935   :  { %v1047_v36 = vadd.f32 %v1087_v58, %v1046_v8  ;;  %v1675_v37 = vpop.f32.mrb[17].mxu0 }
 0x937   :  { %1976 = vtanh.f32 %v1047_v36 }
 0x941   :  { %v1977_v38 = vpop.eup %1976 }
 0x942   :  { %1051 = vst [vmem:[#allocation12] sm:$0xff] %v1977_v38 }
 0x943   :  { %2121 = shalt.err (!%p2118_p10)
}
 0x944   :  { %s2122_s7 = scalar_lea.hbm %s2541_s9, 128 }
 0x945   :  { %p2123_p11 = scmp.ne.s32.totalorder %s2541_s9, %s2122_s7  ;;  %p2126_p12 = scmp.lt.u32.totalorder %s2122_s7, %s2541_s9 }
 0x947   :  { %p2128_p13 = pnand %p2126_p12, %p2123_p11 }
 0x949   :  { %2131 = shalt.err (!%p2128_p13)
}
 0x94a   :  { %1073 = dma.vmem_to_hbm [thread:$0]  %s1071_s24, 128, %s2541_s9, [#allocation13]  }
 0x94b   :  { %2138 = dma.done.wait [#allocation4], 1024  }
 0x94c   :  { %2139 = vsyncadd [#allocation4], 4294966272 }
 0x94d   :  { %2140 = dma.done.wait [#allocation13], 128  }
 0x94e   :  { %2141 = vsyncadd [#allocation13], 4294967168 }
 0x94f   :  { %1080 = vsyncpa [#allocation3], 1 }
 0x950   :  { %1081 = vsyncpa [#allocation6], 1 }
 0x951   :  { %1082 = vsyncpa [#allocation9], 1 }
 0x952   :  { %1083 = vsyncpa [#allocation4], 1 }
 0x953   :  { %1084 = vsyncpa [#allocation13], 1 }

</bundles_post_ra>
